<compile_context>
chip_gen: v6e
topology: v6e:2x2x1
jax: 0.10.0
libtpu: 0.0.40
codegen_flags: <defaults>
</compile_context>

<pallas_src>
import functools
import math

import jax
import jax.numpy as jnp
from jax.experimental import pallas as pl
from jax.experimental.pallas import tpu as pltpu


def _round_up(x, m):
    return ((x + m - 1) // m) * m


def _cdiv(a, b):
    return (a + b - 1) // b


def _sigmoid(h):
    # Single EUP op per element (tanh); the affine mul/add is free VPU filler.
    return 0.5 * jnp.tanh(0.5 * h) + 0.5


def _decoder_kernel(x_ref,
                    w1_ref, b1_ref,
                    w2_ref, b2_ref,
                    w3_ref, b3_ref,
                    o_ref):
    """Fused 3-layer MLP: (Linear+ReLU) -> (Linear+Sigmoid) -> (Linear+Sigmoid).

    Dropout layers are identity at inference and therefore omitted.
    Matmul inputs use the weight dtype (bf16 by default); accumulation and all
    element-wise math stay in f32. x is cast in-kernel (rides the f32 DMA).
    """
    cdt = w1_ref.dtype
    x = x_ref[...].astype(cdt)

    # Layer 1: Linear(latent -> h1) + ReLU   (+ Dropout == identity in eval)
    h = jnp.dot(x, w1_ref[...], preferred_element_type=jnp.float32) + b1_ref[...]
    h = jnp.maximum(h, 0.0)

    # Layer 2: Linear(h1 -> h2) + Sigmoid    (+ Dropout == identity in eval)
    h = jnp.dot(h.astype(cdt), w2_ref[...],
                preferred_element_type=jnp.float32) + b2_ref[...]
    h = _sigmoid(h)

    # Output layer: Linear(h2 -> out) + Sigmoid (activations[-1] after reverse)
    h = jnp.dot(h.astype(cdt), w3_ref[...],
                preferred_element_type=jnp.float32) + b3_ref[...]
    o_ref[...] = _sigmoid(h).astype(o_ref.dtype)


def prepare_decoder_params(params, compute_dtype=jnp.bfloat16):
    """Pad feature dims to 128 lanes and cast weights ONCE (hoisted out of the
    per-call forward path). Zero-padding is numerically exact for Linear layers.

    Returns (padded_params, output_dim)."""
    w1, b1, w2, b2, w3, b3 = params
    d_in = w1.shape[0]
    h1, h2, d_out = w1.shape[1], w2.shape[1], w3.shape[1]
    h1p, h2p, d_outp = (_round_up(d, 128) for d in (h1, h2, d_out))
    cdt = compute_dtype
    # Weight contraction dims: layer-1 keeps the true d_in (x is unpadded).
    w1p = jnp.zeros((d_in, h1p), cdt).at[:, :h1].set(w1.astype(cdt))
    w2p = jnp.zeros((h1p, h2p), cdt).at[:h1, :h2].set(w2.astype(cdt))
    w3p = jnp.zeros((h2p, d_outp), cdt).at[:h2, :d_out].set(w3.astype(cdt))
    b1p = jnp.zeros((1, h1p), jnp.float32).at[:, :h1].set(b1.astype(jnp.float32))
    b2p = jnp.zeros((1, h2p), jnp.float32).at[:, :h2].set(b2.astype(jnp.float32))
    b3p = jnp.zeros((1, d_outp), jnp.float32).at[:, :d_out].set(b3.astype(jnp.float32))
    return (w1p, b1p, w2p, b2p, w3p, b3p), d_out


def _vmem_capacity_bytes():
    try:
        return int(pltpu.get_tpu_info().vmem_capacity_bytes)
    except Exception:
        return 64 << 20  # conservative fallback (v7x per-TC VMEM)


def _vmem_estimate(tile, d_in, h1p, h2p, d_outp, csize, osize):
    io = 2 * tile * (d_in * 4 + d_outp * osize)                  # dbl-buffered x (f32) + out
    wb = 2 * ((d_in * h1p + h1p * h2p + h2p * d_outp) * csize    # resident weights (dbl-buffered
              + (h1p + h2p + d_outp) * 4)                        #  by default) + f32 biases
    inter = tile * (h1p + h2p + d_outp) * 4 + tile * max(h1p, h2p) * csize
    return io + wb + inter


@functools.partial(jax.jit, static_argnames=("output_dim", "batch_tile",
                                             "min_parallel_steps", "out_dtype"))
def decoder_forward(x, padded_params, *, output_dim, batch_tile=512,
                    min_parallel_steps=2, out_dtype=jnp.float32):
    """Run the fused decoder kernel.

    x: [B, latent_dim] float32 (unpadded; cast to compute dtype in-kernel)
    padded_params: output of prepare_decoder_params()
    output_dim: true (unpadded) output feature count
    batch_tile: max rows per grid step
    min_parallel_steps: keep >= this many grid steps (megacore sharding on v7x)
    out_dtype: kernel output dtype (bf16 halves writeback bytes, e.g. on v5e)
    """
    w1p, b1p, w2p, b2p, w3p, b3p = padded_params
    B, d_in = x.shape
    h1p, h2p, d_outp = w1p.shape[1], w2p.shape[1], w3p.shape[1]
    csize = jnp.dtype(w1p.dtype).itemsize
    osize = jnp.dtype(out_dtype).itemsize

    # ---- generation-aware VMEM budget with headroom (v7x: ~48 MiB; v6e: ~96) --
    budget = int(0.75 * _vmem_capacity_bytes())

    # ---- adaptive batch tiling: no round-up of B to a tile multiple ----------
    n_steps = _cdiv(B, batch_tile)
    if B >= 8 * min_parallel_steps:
        n_steps = max(n_steps, min_parallel_steps)   # >=2 steps keeps both v7x TCs busy
    tile = _round_up(_cdiv(B, n_steps), 8)
    while tile > 8 and _vmem_estimate(tile, d_in, h1p, h2p, d_outp, csize, osize) > budget:
        tile = max(8, _round_up(tile // 2, 8))
    grid = (_cdiv(B, tile),)                          # ragged last tile is masked by Pallas

    est = _vmem_estimate(tile, d_in, h1p, h2p, d_outp, csize, osize)
    vmem_limit = int(min(budget, max(2 * est, 16 << 20)))

    cost = pl.CostEstimate(
        flops=2 * B * (d_in * h1p + h1p * h2p + h2p * d_outp),
        transcendentals=B * (h2p + d_outp),           # one tanh per sigmoid element
        bytes_accessed=int(B * d_in * x.dtype.itemsize
                           + B * d_outp * osize
                           + (w1p.size + w2p.size + w3p.size) * csize
                           + (b1p.size + b2p.size + b3p.size) * 4),
    )

    in_specs = [
        # x: tiled over batch; feature dim uses the full-array-dim exception
        # (no lane padding needed in the wrapper).
        pl.BlockSpec((tile, d_in), lambda i: (i, 0)),
        # Weights/biases have constant (0, 0) index maps: kept VMEM-resident,
        # not re-fetched across grid steps.
        pl.BlockSpec((d_in, h1p), lambda i: (0, 0)),      # w1
        pl.BlockSpec((1, h1p), lambda i: (0, 0)),         # b1
        pl.BlockSpec((h1p, h2p), lambda i: (0, 0)),       # w2
        pl.BlockSpec((1, h2p), lambda i: (0, 0)),         # b2
        pl.BlockSpec((h2p, d_outp), lambda i: (0, 0)),    # w3
        pl.BlockSpec((1, d_outp), lambda i: (0, 0)),      # b3
    ]
    out_spec = pl.BlockSpec((tile, d_outp), lambda i: (i, 0))

    out = pl.pallas_call(
        _decoder_kernel,
        out_shape=jax.ShapeDtypeStruct((B, d_outp), out_dtype),
        grid_spec=pltpu.PrefetchScalarGridSpec(
            num_scalar_prefetch=0,
            grid=grid,
            in_specs=in_specs,
            out_specs=out_spec,
        ),
        compiler_params=pltpu.CompilerParams(
            dimension_semantics=("parallel",),     # shards batch steps across TCs
            vmem_limit_bytes=vmem_limit,
        ),
        cost_estimate=cost,
    )(x, w1p, b1p, w2p, b2p, w3p, b3p)

    return out[:, :output_dim]


def init_decoder_params(key, latent_dim, hidden_dims, output_dim):
    """Deterministic parameter init mirroring the PyTorch module structure.

    hidden_dims is reversed (as in the module's __init__).
    Returns weights as [in, out] and biases as [1, out], all float32.
    """
    hd = list(reversed(hidden_dims))
    dims = [latent_dim] + hd + [output_dim]
    params = []
    for i in range(len(dims) - 1):
        key, kw, kb = jax.random.split(key, 3)
        bound = 1.0 / math.sqrt(dims[i])
        w = jax.random.uniform(kw, (dims[i], dims[i + 1]),
                               minval=-bound, maxval=bound, dtype=jnp.float32)
        b = jax.random.uniform(kb, (1, dims[i + 1]),
                               minval=-bound, maxval=bound, dtype=jnp.float32)
        params.extend([w, b])
    return tuple(params)


def decoder_ref(x, params):
    """Pure-JAX reference for correctness check (exact f32 math)."""
    w1, b1, w2, b2, w3, b3 = params
    h = jnp.maximum(x @ w1 + b1, 0.0)          # Linear + ReLU   (+ dropout = id)
    h = jax.nn.sigmoid(h @ w2 + b2)            # Linear + Sigmoid (+ dropout = id)
    return jax.nn.sigmoid(h @ w3 + b3)         # Linear + Sigmoid


if __name__ == "__main__":
    # Small shapes consistent with the module: latent_dim=100 (module default,
    # deliberately NOT a multiple of 128 to exercise the full-dim BlockSpec),
    # scaled-down hidden dims (reversed inside init like the module),
    # non-128-aligned output dim.
    LATENT_DIM = 100
    HIDDEN_DIMS = [256, 128]   # scaled-down [1024, 512]; reversed in init
    OUTPUT_DIM = 200

    key = jax.random.PRNGKey(0)
    key, kx = jax.random.split(key)
    params = init_decoder_params(key, LATENT_DIM, HIDDEN_DIMS, OUTPUT_DIM)

    # One-time (hoisted) weight pad + cast, for both compute paths.
    prep_f32, d_out = prepare_decoder_params(params, compute_dtype=jnp.float32)
    prep_bf16, _ = prepare_decoder_params(params, compute_dtype=jnp.bfloat16)

    # batch=64 -> 2 even tiles (megacore-friendly); batch=200 with batch_tile=128
    # -> 2 steps, tile=104, ragged final tile (exercises partial-block masking
    # without any batch round-up to a full tile multiple).
    for batch in (64, 200):
        kx, sub = jax.random.split(kx)
        x = jax.random.normal(sub, (batch, LATENT_DIM), dtype=jnp.float32)
        ref = decoder_ref(x, params)

        # f32 matmul path: tight check.
        out_f32 = jax.block_until_ready(
            decoder_forward(x, prep_f32, output_dim=d_out, batch_tile=128))
        assert out_f32.shape == (batch, OUTPUT_DIM)
        assert jnp.allclose(out_f32, ref, atol=2e-3, rtol=2e-3), "f32 mismatch vs reference"

        # bf16 matmul path (default, MXU-optimal on v6e/v7x): looser tolerance.
        out_bf16 = jax.block_until_ready(
            decoder_forward(x, prep_bf16, output_dim=d_out, batch_tile=128))
        assert out_bf16.shape == (batch, OUTPUT_DIM)
        assert jnp.allclose(out_bf16, ref, atol=3e-2, rtol=3e-2), "bf16 mismatch vs reference"

    # TODO(synk): train-mode nn.Dropout (stochastic masking) is not modeled;
    # inference-mode dropout is identity, which is what the kernel implements.
    print("KERNEL_OK")
</pallas_src>

<mosaic_0001>
module attributes {stable_mosaic.version = 11 : i64} {
  func.func @_decoder_kernel(%arg0: i32, %arg1: memref<32x100xf32, #tpu.memory_space<vmem>>, %arg2: memref<100x128xf32, #tpu.memory_space<vmem>>, %arg3: memref<1x128xf32, #tpu.memory_space<vmem>>, %arg4: memref<128x256xf32, #tpu.memory_space<vmem>>, %arg5: memref<1x256xf32, #tpu.memory_space<vmem>>, %arg6: memref<256x256xf32, #tpu.memory_space<vmem>>, %arg7: memref<1x256xf32, #tpu.memory_space<vmem>>, %arg8: memref<32x256xf32, #tpu.memory_space<vmem>>) attributes {dimension_semantics = [#tpu.dimension_semantics<parallel>], iteration_bounds = array<i64: 2>, scalar_prefetch = 0 : i64, scratch_operands = 0 : i64, tpu.core_type = #tpu.core_type<tc>, window_params = [{transform_indices = @transform_0, window_bounds = array<i64: 32, 100>}, {pipeline_mode = #tpu.pipeline_mode<synchronous>, transform_indices = @transform_1, window_bounds = array<i64: 100, 128>}, {pipeline_mode = #tpu.pipeline_mode<synchronous>, transform_indices = @transform_2, window_bounds = array<i64: 1, 128>}, {pipeline_mode = #tpu.pipeline_mode<synchronous>, transform_indices = @transform_3, window_bounds = array<i64: 128, 256>}, {pipeline_mode = #tpu.pipeline_mode<synchronous>, transform_indices = @transform_4, window_bounds = array<i64: 1, 256>}, {pipeline_mode = #tpu.pipeline_mode<synchronous>, transform_indices = @transform_5, window_bounds = array<i64: 256, 256>}, {pipeline_mode = #tpu.pipeline_mode<synchronous>, transform_indices = @transform_6, window_bounds = array<i64: 1, 256>}, {transform_indices = @transform_7, window_bounds = array<i64: 32, 256>}]} {
    %c0 = arith.constant 0 : index
    %c0_0 = arith.constant 0 : index
    %0 = vector.load %arg1[%c0, %c0_0] : memref<32x100xf32, #tpu.memory_space<vmem>>, vector<32x100xf32>
    %c0_1 = arith.constant 0 : index
    %c0_2 = arith.constant 0 : index
    %1 = vector.load %arg2[%c0_1, %c0_2] : memref<100x128xf32, #tpu.memory_space<vmem>>, vector<100x128xf32>
    %cst = arith.constant dense<0.000000e+00> : vector<32x128xf32>
    %2 = tpu.matmul %0, %1, %cst {dimension_numbers = #tpu.dot_dimension_numbers<[1], [0], [0], [1], [0, 0, 1, 1], [], []>} : vector<32x100xf32>, vector<100x128xf32>, vector<32x128xf32> -> vector<32x128xf32>
    %c0_3 = arith.constant 0 : index
    %c0_4 = arith.constant 0 : index
    %3 = vector.load %arg3[%c0_3, %c0_4] : memref<1x128xf32, #tpu.memory_space<vmem>>, vector<1x128xf32>
    %4 = vector.broadcast %3 : vector<1x128xf32> to vector<32x128xf32>
    %5 = arith.addf %2, %4 : vector<32x128xf32>
    %cst_5 = arith.constant 0.000000e+00 : f32
    %6 = vector.broadcast %cst_5 : f32 to vector<32x128xf32>
    %7 = arith.maximumf %5, %6 : vector<32x128xf32>
    %c0_6 = arith.constant 0 : index
    %c0_7 = arith.constant 0 : index
    %8 = vector.load %arg4[%c0_6, %c0_7] : memref<128x256xf32, #tpu.memory_space<vmem>>, vector<128x256xf32>
    %cst_8 = arith.constant dense<0.000000e+00> : vector<32x256xf32>
    %9 = tpu.matmul %7, %8, %cst_8 {dimension_numbers = #tpu.dot_dimension_numbers<[1], [0], [0], [1], [0, 0, 1, 1], [], []>} : vector<32x128xf32>, vector<128x256xf32>, vector<32x256xf32> -> vector<32x256xf32>
    %c0_9 = arith.constant 0 : index
    %c0_10 = arith.constant 0 : index
    %10 = vector.load %arg5[%c0_9, %c0_10] : memref<1x256xf32, #tpu.memory_space<vmem>>, vector<1x256xf32>
    %11 = vector.broadcast %10 : vector<1x256xf32> to vector<32x256xf32>
    %12 = arith.addf %9, %11 : vector<32x256xf32>
    %cst_11 = arith.constant 5.000000e-01 : f32
    %13 = vector.broadcast %cst_11 : f32 to vector<32x256xf32>
    %14 = arith.mulf %13, %12 : vector<32x256xf32>
    %15 = math.tanh %14 : vector<32x256xf32>
    %cst_12 = arith.constant 5.000000e-01 : f32
    %16 = vector.broadcast %cst_12 : f32 to vector<32x256xf32>
    %17 = arith.mulf %16, %15 : vector<32x256xf32>
    %cst_13 = arith.constant 5.000000e-01 : f32
    %18 = vector.broadcast %cst_13 : f32 to vector<32x256xf32>
    %19 = arith.addf %17, %18 : vector<32x256xf32>
    %c0_14 = arith.constant 0 : index
    %c0_15 = arith.constant 0 : index
    %20 = vector.load %arg6[%c0_14, %c0_15] : memref<256x256xf32, #tpu.memory_space<vmem>>, vector<256x256xf32>
    %cst_16 = arith.constant dense<0.000000e+00> : vector<32x256xf32>
    %21 = tpu.matmul %19, %20, %cst_16 {dimension_numbers = #tpu.dot_dimension_numbers<[1], [0], [0], [1], [0, 0, 1, 1], [], []>} : vector<32x256xf32>, vector<256x256xf32>, vector<32x256xf32> -> vector<32x256xf32>
    %c0_17 = arith.constant 0 : index
    %c0_18 = arith.constant 0 : index
    %22 = vector.load %arg7[%c0_17, %c0_18] : memref<1x256xf32, #tpu.memory_space<vmem>>, vector<1x256xf32>
    %23 = vector.broadcast %22 : vector<1x256xf32> to vector<32x256xf32>
    %24 = arith.addf %21, %23 : vector<32x256xf32>
    %cst_19 = arith.constant 5.000000e-01 : f32
    %25 = vector.broadcast %cst_19 : f32 to vector<32x256xf32>
    %26 = arith.mulf %25, %24 : vector<32x256xf32>
    %27 = math.tanh %26 : vector<32x256xf32>
    %cst_20 = arith.constant 5.000000e-01 : f32
    %28 = vector.broadcast %cst_20 : f32 to vector<32x256xf32>
    %29 = arith.mulf %28, %27 : vector<32x256xf32>
    %cst_21 = arith.constant 5.000000e-01 : f32
    %30 = vector.broadcast %cst_21 : f32 to vector<32x256xf32>
    %31 = arith.addf %29, %30 : vector<32x256xf32>
    %c0_22 = arith.constant 0 : index
    %c0_23 = arith.constant 0 : index
    %32 = vector.load %arg8[%c0_22, %c0_23] : memref<32x256xf32, #tpu.memory_space<vmem>>, vector<32x256xf32>
    tpu.vector_store %arg8[%c0_22, %c0_23], %31 {strides = array<i32>} : memref<32x256xf32, #tpu.memory_space<vmem>>, vector<32x256xf32>,
    return
  }
  func.func @transform_0(%arg0: i32) -> (i32, i32) {
    %c0_i32 = arith.constant 0 : i32
    %c0_i32_0 = arith.constant 0 : i32
    return %arg0, %c0_i32 : i32, i32
  }
  func.func @transform_1(%arg0: i32) -> (i32, i32) {
    %c0_i32 = arith.constant 0 : i32
    %c0_i32_0 = arith.constant 0 : i32
    %c0_i32_1 = arith.constant 0 : i32
    return %c0_i32, %c0_i32_0 : i32, i32
  }
  func.func @transform_2(%arg0: i32) -> (i32, i32) {
    %c0_i32 = arith.constant 0 : i32
    %c0_i32_0 = arith.constant 0 : i32
    %c0_i32_1 = arith.constant 0 : i32
    return %c0_i32, %c0_i32_0 : i32, i32
  }
  func.func @transform_3(%arg0: i32) -> (i32, i32) {
    %c0_i32 = arith.constant 0 : i32
    %c0_i32_0 = arith.constant 0 : i32
    %c0_i32_1 = arith.constant 0 : i32
    return %c0_i32, %c0_i32_0 : i32, i32
  }
  func.func @transform_4(%arg0: i32) -> (i32, i32) {
    %c0_i32 = arith.constant 0 : i32
    %c0_i32_0 = arith.constant 0 : i32
    %c0_i32_1 = arith.constant 0 : i32
    return %c0_i32, %c0_i32_0 : i32, i32
  }
  func.func @transform_5(%arg0: i32) -> (i32, i32) {
    %c0_i32 = arith.constant 0 : i32
    %c0_i32_0 = arith.constant 0 : i32
    %c0_i32_1 = arith.constant 0 : i32
    return %c0_i32, %c0_i32_0 : i32, i32
  }
  func.func @transform_6(%arg0: i32) -> (i32, i32) {
    %c0_i32 = arith.constant 0 : i32
    %c0_i32_0 = arith.constant 0 : i32
    %c0_i32_1 = arith.constant 0 : i32
    return %c0_i32, %c0_i32_0 : i32, i32
  }
  func.func @transform_7(%arg0: i32) -> (i32, i32) {
    %c0_i32 = arith.constant 0 : i32
    %c0_i32_0 = arith.constant 0 : i32
    return %arg0, %c0_i32 : i32, i32
  }
}

</mosaic_0001>

<bundles_post_ra>
// kernel: decoder_forward.1
= control target key start
LH: loop header
LB: loop body
LE: loop exit
PB: predicated region body
PF: predicated region fallthrough
CT: control target
= control target key end

     0   :  { %s1629_s0 = inlined_call_operand.hbm [shape: f32[64,100], index: 0, kind: input, shape index: {}]   ;;  %s1630_s1 = inlined_call_operand.hbm [shape: f32[100,128], index: 1, kind: input, shape index: {}]   ;;  %s1631_s2 = inlined_call_operand.vmem [shape: f32[1,128], index: 2, kind: input, shape index: {}]   ;;  %s1632_s3 = inlined_call_operand.hbm [shape: f32[128,256], index: 3, kind: input, shape index: {}]   ;;  %s1633_s4 = inlined_call_operand.vmem [shape: f32[1,256], index: 4, kind: input, shape index: {}]   ;;  %s1634_s5 = inlined_call_operand.hbm [shape: f32[256,256], index: 5, kind: input, shape index: {}]   ;;  %s1635_s6 = inlined_call_operand.vmem [shape: f32[1,256], index: 6, kind: input, shape index: {}]   ;;  %s1636_s7 = inlined_call_operand.hbm [shape: f32[64,256], index: 7, kind: output, shape index: {}]  }
   0x1   :  { %1643 = sst [smem:[#allocation15_spill]] %s1630_s1 }
   0x2   :  { %12 = vsyncpa [#allocation3], 0 }
   0x3   :  { %14 = vsyncpa [#allocation3 + $0x1], 0 }
   0x4   :  { %15 = vsyncpa [#allocation6], 0 }
   0x5   :  { %16 = vsyncpa [#allocation9], 0 }
   0x6   :  { %17 = vsyncpa [#allocation4], 0 }
   0x7   :  { %19 = vsyncpa [#allocation4 + $0x1], 0  ;;  %s1387_s24 = smov 0   ;;  %s1389_s25 = smov 0  }
   0x8   :  { %s1391_s26 = smov 0   ;;  %s1393_s27 = smov 0  }
   0x9 LB: > { %s1408_s28 = sadd.s32 4294967295, %s1333_s27   ;;  %s960_s29 = sadd.s32 4294967294, %s1333_s27   ;;  %s1333_s27 = sphi %s1393_s27, %s1665_s27   ;;  %s1329_s26 = sphi %s1391_s26, %s1664_s26   ;;  %s1325_s25 = sphi %s1389_s25, %s1663_s25   ;;  %s1321_s24 = sphi %s1387_s24, %s1662_s24  }
   0xa   : > { %p45_p0 = scmp.ne.s32.totalorder %s1325_s25, %s1321_s24  ;;  %p1638_p1 = scmp.eq.s32.totalorder %s1408_s28, 0 }
   0xb   : > { %p195_p2 = scmp.eq.s32.totalorder %s1408_s28, 1  ;;  %p201_p3 = scmp.eq.s32.totalorder %s960_s29, 1 }
   0xc   : > { %p1417_p4 = por %p1638_p1, %p45_p0  ;;  %p961_p5 = scmp.ge.s32.totalorder %s1333_s27, 1 }
   0xd   : > { %p1422_p6 = por %p201_p3, %p45_p0  ;;  %p208_p7 = scmp.lt.s32.totalorder %s1333_s27, 3 }
   0xe   : > { %s1644_s30 = scalar_select %p1417_p4, 1, 0 }
   0xf   : > { %s1645_s8 = scalar_select %p1422_p6, 1, 0 }
  0x10   : > { %p1427_p8 = pnand %p961_p5, %p208_p7  ;;  %s1335_s10 = smov [#allocation5]  }
  0x11   : > { %s220_s11 = sshll.u32 %s1335_s10, 4  ;;  %s1336_s13 = smov [#allocation7]   ;;  %s221_s11 = int_to_ptr.vmem [resolvable:$true] %s220_s11 }
  0x12   : > { %s1646_s9 = scalar_select %p1427_p8, 1, 0 }
  0x13   : > { %p1055_p9 = pneg %p1427_p8  ;;  %s236_s14 = sshll.u32 %s1336_s13, 4  ;;  %s237_s14 = int_to_ptr.vmem [resolvable:$true] %s236_s14 }
  0x14   : > { %s1166_s15 = scalar_lea.vmem %s221_s11, 1664  ;;  %p1174_p5 = scmp.lt.s32.totalorder %s221_s11, %s221_s11 }
  0x15   : > { %p1436_p11 = pnand %p1055_p9, %p1638_p1  ;;  %p1167_p13 = scmp.ne.s32.totalorder %s221_s11, %s1166_s15 }
  0x16   : > { %p1175_p7 = scmp.lt.s32.totalorder %s1166_s15, %s1166_s15 }
  0x17   : > { %p1157_p12 = pneg %p1436_p11 }
  0x18   : > { %p1176_p10 = por %p1175_p7, %p1174_p5 }
  0x19   : > { %p1169_p0 = pnand %p1167_p13, %p1157_p12 }
  0x1b   : > { %p1170_p3 = pneg %p1169_p0 }
  0x1d   : > { %p1177_p9 = pnand %p1176_p10, %p1170_p3 }
  0x1f   : > { %1180 = shalt.err (!%p1177_p9)
}
  0x20   : > { %s1637_s16 = smov 128   ;;  %s1639_s17 = smov 8  }
  0x21   : > { %s1648_s1 = sld [smem:[#allocation15_spill]]  ;;  %s1192_s20 = scalar_lea.vmem %s237_s14, 4096 }
  0x22   : > { %p1193_p13 = scmp.ne.s32.totalorder %s237_s14, %s1192_s20  ;;  %p1200_p10 = scmp.lt.s32.totalorder %s237_s14, %s237_s14 }
  0x23   : > { %p1201_p3 = scmp.lt.s32.totalorder %s1192_s20, %s1192_s20 }
  0x24   : > { %p1195_p0 = pnand %p1193_p13, %p1157_p12 }
  0x25   : > { %p1202_p7 = por %p1201_p3, %p1200_p10 }
  0x26   : > { %p1196_p5 = pneg %p1195_p0 }
  0x27   : > { %1058 = dma.hbm_to_vmem [thread:$0]  (!%p1436_p11), %s1648_s1, 1664, %s221_s11, [#allocation6], %s1637_s16, %s1637_s16, %s1639_s17  }
  0x28   : > { %p1203_p9 = pnand %p1202_p7, %p1196_p5 }
  0x2a   : > { %1206 = shalt.err (!%p1203_p9)
}
  0x2b   : > { %s1339_s21 = smov 256   ;;  %s1340_s22 = smov 16  }
  0x2c   : > { %1061 = dma.hbm_to_vmem [thread:$0]  (!%p1436_p11), %s1632_s3, 4096, %s237_s14, [#allocation6], %s1339_s21, %s1339_s21, %s1340_s22  }
  0x2d   : > { %s1341_s10 = smov [#allocation8]   ;;  %s1462_s13 = sadd.s32 1, %s1333_s27  }
  0x2e   : > { %s252_s11 = sshll.u32 %s1341_s10, 4  ;;  %s253_s11 = int_to_ptr.vmem [resolvable:$true] %s252_s11 }
  0x2f   : > { %s1218_s15 = scalar_lea.vmem %s253_s11, 8192  ;;  %p1226_p10 = scmp.lt.s32.totalorder %s253_s11, %s253_s11 }
  0x30   : > { %p1219_p13 = scmp.ne.s32.totalorder %s253_s11, %s1218_s15  ;;  %p1227_p3 = scmp.lt.s32.totalorder %s1218_s15, %s1218_s15 }
  0x32   : > { %p1221_p0 = pnand %p1219_p13, %p1157_p12  ;;  %p1228_p7 = por %p1227_p3, %p1226_p10 }
  0x34   : > { %p1222_p5 = pneg %p1221_p0 }
  0x36   : > { %p1229_p9 = pnand %p1228_p7, %p1222_p5 }
  0x38   : > { %1232 = shalt.err (!%p1229_p9)
}
  0x39   : > { %1064 = dma.hbm_to_vmem [thread:$0]  (!%p1436_p11), %s1634_s5, 8192, %s253_s11, [#allocation9], %s1339_s21, %s1339_s21, %s1340_s22  }
  0x3a   : > { %s29_s19 = ssub.s32 %s1333_s27, %s1462_s13  ;;  %s32_s20 = sadd.s32 1, %s1329_s26 }
  0x3b   : > { %p30_p12 = scmp.eq.s32.totalorder %s29_s19, 0  ;;  %p39_p13 = scmp.ne.s32.totalorder %s1329_s26, %s1325_s25 }
  0x3c   : > { %p40_p0 = scmp.eq.s32.totalorder %s1333_s27, 0  ;;  %p1076_p5 = scmp.lt.s32.totalorder %s1333_s27, 2 }
  0x3d   : > { %s1480_s12 = scalar_select %p30_p12, %s1329_s26, %s32_s20  }
  0x3e   : > { %p41_p10 = por %p40_p0, %p39_p13  ;;  %p1484_p3 = por %p195_p2, %p39_p13 }
  0x3f   : > { %s269_s29 = sand.u32 1, %s1329_s26   ;;  %s987_s10 = sshll.u32 %s1333_s27, 9 }
  0x40   : > { %s1649_s23 = scalar_select %p1484_p3, 1, 0 }
  0x41   : > { %s966_s15 = sshll.u32 %s269_s29, 5  ;;  %s1493_s21 = scalar_lea.hbm %s1629_s0, %s987_s10 }
  0x42   : > { %s273_s22 = scalar_lea.vmem [#allocation2], %s966_s15  ;;  %p1495_p11 = pnand %p1076_p5, %p41_p10 }
  0x43   : > { %s280_s11 = sshll.u32 %s273_s22, 4  ;;  %s1501_s20 = scalar_lea.sflag [#allocation3], %s269_s29  ;;  %s1499_s11 = int_to_ptr.vmem [resolvable:$true] %s280_s11 }
  0x44   : > { %s1233_s16 = scalar_lea.hbm %s1493_s21, 512  ;;  %p1235_p7 = pneg %p1495_p11 }
  0x45   : > { %p1234_p2 = scmp.ne.s32.totalorder %s1493_s21, %s1233_s16  ;;  %s1238_s15 = scalar_lea.hbm %s1629_s0, 1024 }
  0x46   : > { %p1239_p13 = scmp.lt.s32.totalorder %s1493_s21, %s1629_s0  ;;  %p1240_p0 = scmp.lt.s32.totalorder %s1238_s15, %s1233_s16 }
  0x47   : > { %p1236_p9 = pnand %p1235_p7, %p1234_p2 }
  0x48   : > { %p1241_p5 = por %p1240_p0, %p1239_p13 }
  0x49   : > { %p1237_p12 = pneg %p1236_p9 }
  0x4b   : > { %p1242_p10 = pnand %p1241_p5, %p1237_p12 }
  0x4d   : > { %1245 = shalt.err (!%p1242_p10)
}
  0x4e   : > { %s1246_s29 = scalar_lea.vmem %s1499_s11, 512  ;;  %s1342_s17 = smov [#allocation2]  }
  0x4f   : > { %p1247_p1 = scmp.ne.s32.totalorder %s1499_s11, %s1246_s29  ;;  %s1251_s1 = sshll.u32 %s1342_s17, 4  ;;  %s1252_s1 = int_to_ptr.vmem [resolvable:$false] %s1251_s1 }
  0x50   : > { %s1253_s10 = scalar_lea.vmem %s1252_s1, 1024  ;;  %p1254_p9 = scmp.lt.s32.totalorder %s1499_s11, %s1252_s1 }
  0x51   : > { %p1249_p6 = pnand %p1247_p1, %p1235_p7  ;;  %p1255_p3 = scmp.lt.s32.totalorder %s1253_s10, %s1246_s29 }
  0x53   : > { %p1250_p2 = pneg %p1249_p6  ;;  %p1256_p4 = por %p1255_p3, %p1254_p9 }
  0x55   : > { %p1257_p8 = pnand %p1256_p4, %p1250_p2 }
  0x57   : > { %1260 = shalt.err (!%p1257_p8)
}
  0x58   : > { %s1651_s16 = smov 8   ;;  %s1652_s18 = smov 128  }
  0x59   : > { %1068 = dma.hbm_to_vmem [thread:$0]  (!%p1495_p11), %s1493_s21, 512, %s1499_s11, %s1501_s20, %s1652_s18, %s1652_s18, %s1651_s16  }
  0x5a   : > { %p1653_p1 = scmp.ne.s32.totalorder %s1646_s9, 0 }
  0x5b   : > { %s1528_s17 = sand.u32 (!%p1653_p1), 1, %s1325_s25   ;;  %p1654_p4 = scmp.ne.s32.totalorder (!%p1653_p1), %s1644_s30, 0 }
  0x5c   : > { %292 = sbr.rel (%p1653_p1) target bundleno = 791 (0x317), region = 48  ;;  %s970_s1 = sshll.u32 (!%p1653_p1), %s1528_s17, 5 }
  0x5d   : > { %s295_s15 = scalar_lea.sflag (!%p1653_p1), [#allocation3], %s1528_s17  ;;  %s1532_s14 = scalar_lea.vmem (!%p1653_p1), [#allocation2], %s970_s1 }
  0x61   : > { %1304 = dma.done.wait (%p1654_p4), %s295_s15, 512  }
  0x62   : > { %1306 = vsyncadd (%p1654_p4), %s295_s15, 4294966784  ;;  %p1655_p6 = scmp.eq.s32.totalorder %s1408_s28, 0 }
  0x64   : > { %1308 = dma.done.wait (%p1655_p6), [#allocation6], 5760   ;;  %p1656_p8 = pmov %p1655_p6 }
  0x65   : > { %p1657_p3 = pmov %p1655_p6 }
  0x66   : > { %1310 = vsyncadd (%p1656_p8), [#allocation6], 4294961536 }
  0x67   : > { %1312 = dma.done.wait (%p1657_p3), [#allocation9], 8192   ;;  %p1658_p11 = pmov %p1657_p3 }
  0x68   : > { %vm380_vm0 = vcmask 1043456   ;;  %v359_v0 = vld [vmem:[#allocation5 + $0x60] sm:$0xf]  ;;  %v358_v1 = vld [vmem:[#allocation5 + $0x58] sm:$0xff]  ;;  %v357_v2 = vld [vmem:[#allocation5 + $0x50] sm:$0xff]  ;;  %vm367_vm1 = vcmask 818176  }
  0x69   : > { %1314 = vsyncadd (%p1658_p11), [#allocation9], 4294959104  ;;  %1007 = vmatprep.subr.msk.mxu1 %vm380_vm0, %v359_v0  ;;  %v356_v3 = vld [vmem:[#allocation5 + $0x48] sm:$0xff]  ;;  %v343_v4 = vld [vmem:[%s1532_s14] sm:$0xff]  ;;  %v1343_v49 = vmov 0.0   ;;  %s974_s22 = sshll.u32 %s1528_s17, 6 }
  0x6a   : > { %1008 = vmatpush3.msk.msra.mxu1 %vm380_vm0, %v359_v0  ;;  %1033 = vmatprep.mubr.msk.f32.mxu1 %vm367_vm1, %v343_v4  ;;  %v355_v5 = vld [vmem:[#allocation5 + $0x40] sm:$0xff]  ;;  %v354_v6 = vld [vmem:[#allocation5 + $0x38] sm:$0xff]  ;;  %v353_v7 = vld [vmem:[#allocation5 + $0x30] sm:$0xff]  ;;  %s340_s29 = scalar_lea.vmem [#allocation10], %s974_s22  ;;  %s989_s10 = sshll.u32 %s1408_s28, 10 }
  0x6b   : > { %1009 = vmatprep.subr.mxu1 %v358_v1  ;;  %v352_v8 = vld [vmem:[#allocation5 + $0x28] sm:$0xff]  ;;  %v351_v9 = vld [vmem:[#allocation5 + $0x20] sm:$0xff]  ;;  %v350_v10 = vld [vmem:[#allocation5 + $0x18] sm:$0xff]  ;;  %s858_s16 = sshll.u32 %s340_s29, 4  ;;  %s1584_s15 = scalar_lea.hbm %s1636_s7, %s989_s10  ;;  %s1586_s16 = int_to_ptr.vmem [resolvable:$true] %s858_s16 }
  0x6c   : > { %1010 = vmatpush3.msra.mxu1 %v358_v1  ;;  %v349_v11 = vld [vmem:[#allocation5 + $0x10] sm:$0xff]  ;;  %v348_v12 = vld [vmem:[#allocation5 + $0x8] sm:$0xff]  ;;  %v347_v13 = vld [vmem:[#allocation5] sm:$0xff]  ;;  %s1261_s28 = scalar_lea.vmem %s1586_s16, 1024  ;;  %p1659_p12 = scmp.ne.s32.totalorder %s1649_s23, 0 }
  0x6d   : > { %1011 = vmatprep.subr.mxu1 %v357_v2  ;;  %v344_v14 = vld [vmem:[%s1532_s14 + $0x8] sm:$0xff]  ;;  %v504_v15 = vld [vmem:[#allocation7 + $0xf8] sm:$0xff]  ;;  %v345_v16 = vld [vmem:[%s1532_s14 + $0x10] sm:$0xff]  ;;  %p1262_p7 = scmp.ne.s32.totalorder %s1586_s16, %s1261_s28  ;;  %s1344_s30 = smov [#allocation10]  }
  0x6e   : > { %1012 = vmatpush3.msra.mxu1 %v357_v2  ;;  %v503_v17 = vld [vmem:[#allocation7 + $0xf0] sm:$0xff]  ;;  %v502_v18 = vld [vmem:[#allocation7 + $0xe8] sm:$0xff]  ;;  %v501_v19 = vld [vmem:[#allocation7 + $0xe0] sm:$0xff]  ;;  %s1265_s9 = sshll.u32 %s1344_s30, 4  ;;  %s1266_s9 = int_to_ptr.vmem [resolvable:$false] %s1265_s9 }
  0x6f   : > { %1013 = vmatprep.subr.mxu1 %v356_v3  ;;  %v346_v20 = vld [vmem:[%s1532_s14 + $0x18] sm:$0xff]  ;;  %v500_v21 = vld [vmem:[#allocation7 + $0xd8] sm:$0xff]  ;;  %v498_v23 = vld [vmem:[#allocation7 + $0xc8] sm:$0xff]  ;;  %s844_s14 = scalar_lea.sflag [#allocation4], %s1528_s17  ;;  %p1263_p13 = pnand %p1262_p7, %p1659_p12 }
  0x70   : > { %1014 = vmatpush3.msra.mxu1 %v356_v3  ;;  %v499_v22 = vld [vmem:[#allocation7 + $0xd0] sm:$0xff]  ;;  %v497_v24 = vld [vmem:[#allocation7 + $0xc0] sm:$0xff]  ;;  %v496_v25 = vld [vmem:[#allocation7 + $0xb8] sm:$0xff]  ;;  %s1267_s21 = scalar_lea.vmem %s1266_s9, 2048  ;;  %p1268_p5 = scmp.lt.s32.totalorder %s1586_s16, %s1266_s9 }
  0x71   : > { %1015 = vmatprep.subr.mxu1 %v355_v5  ;;  %v495_v26 = vld [vmem:[#allocation7 + $0xb0] sm:$0xff]  ;;  %v494_v27 = vld [vmem:[#allocation7 + $0xa8] sm:$0xff]  ;;  %v493_v28 = vld [vmem:[#allocation7 + $0xa0] sm:$0xff]  ;;  %p1264_p0 = pneg %p1263_p13  ;;  %p1269_p10 = scmp.lt.s32.totalorder %s1267_s21, %s1261_s28 }
  0x72   : > { %1016 = vmatpush3.msra.mxu1 %v355_v5  ;;  %v492_v29 = vld [vmem:[#allocation7 + $0x98] sm:$0xff]  ;;  %v491_v30 = vld [vmem:[#allocation7 + $0x90] sm:$0xff]  ;;  %v490_v31 = vld [vmem:[#allocation7 + $0x88] sm:$0xff] }
  0x73   : > { %1017 = vmatprep.subr.mxu1 %v354_v6  ;;  %v489_v32 = vld [vmem:[#allocation7 + $0x80] sm:$0xff]  ;;  %v488_v33 = vld [vmem:[#allocation7 + $0x78] sm:$0xff]  ;;  %v487_v34 = vld [vmem:[#allocation7 + $0x70] sm:$0xff]  ;;  %p1270_p2 = por %p1269_p10, %p1268_p5 }
  0x74   : > { %1018 = vmatpush3.msra.mxu1 %v354_v6  ;;  %v486_v35 = vld [vmem:[#allocation7 + $0x68] sm:$0xff]  ;;  %v485_v36 = vld [vmem:[#allocation7 + $0x60] sm:$0xff]  ;;  %v484_v37 = vld [vmem:[#allocation7 + $0x58] sm:$0xff] }
  0x75   : > { %1019 = vmatprep.subr.mxu1 %v353_v7  ;;  %v483_v38 = vld [vmem:[#allocation7 + $0x50] sm:$0xff]  ;;  %v482_v39 = vld [vmem:[#allocation7 + $0x48] sm:$0xff]  ;;  %v481_v40 = vld [vmem:[#allocation7 + $0x40] sm:$0xff]  ;;  %p1271_p9 = pnand %p1270_p2, %p1264_p0 }
  0x76   : > { %1020 = vmatpush3.msra.mxu1 %v353_v7  ;;  %v480_v41 = vld [vmem:[#allocation7 + $0x38] sm:$0xff]  ;;  %v479_v42 = vld [vmem:[#allocation7 + $0x30] sm:$0xff]  ;;  %v478_v43 = vld [vmem:[#allocation7 + $0x28] sm:$0xff] }
  0x77   : > { %1021 = vmatprep.subr.mxu1 %v352_v8  ;;  %v477_v44 = vld [vmem:[#allocation7 + $0x20] sm:$0xff]  ;;  %v476_v45 = vld [vmem:[#allocation7 + $0x18] sm:$0xff]  ;;  %v475_v46 = vld [vmem:[#allocation7 + $0x10] sm:$0xff] }
  0x78   : > { %1022 = vmatpush3.msra.mxu1 %v352_v8  ;;  %v474_v47 = vld [vmem:[#allocation7 + $0x8] sm:$0xff]  ;;  %v473_v48 = vld [vmem:[#allocation7] sm:$0xff]  ;;  %v669_v50 = vld [vmem:[#allocation8 + $0xf8] sm:$0xff] }
  0x79   : > { %1023 = vmatprep.subr.mxu1 %v351_v9  ;;  %v668_v51 = vld [vmem:[#allocation8 + $0xf0] sm:$0xff]  ;;  %v667_v52 = vld [vmem:[#allocation8 + $0xe8] sm:$0xff]  ;;  %714 = vmatprep.subr.mxu0 %v669_v50  ;;  %v666_v53 = vld [vmem:[#allocation8 + $0xe0] sm:$0xff] }
  0x7a   : > { %1024 = vmatpush3.msra.mxu1 %v351_v9  ;;  %715 = vmatpush1.msra.mxu0 %v668_v51  ;;  %v665_v54 = vld [vmem:[#allocation8 + $0xd8] sm:$0xff]  ;;  %v664_v55 = vld [vmem:[#allocation8 + $0xd0] sm:$0xff]  ;;  %v663_v56 = vld [vmem:[#allocation8 + $0xc8] sm:$0xff] }
  0x7b   : > { %1025 = vmatprep.subr.mxu1 %v350_v10  ;;  %716 = vmatprep.subr.mxu0 %v667_v52  ;;  %v662_v57 = vld [vmem:[#allocation8 + $0xc0] sm:$0xff]  ;;  %v661_v58 = vld [vmem:[#allocation8 + $0xb8] sm:$0xff]  ;;  %v660_v59 = vld [vmem:[#allocation8 + $0xb0] sm:$0xff] }
  0x7c   : > { %1026 = vmatpush3.msra.mxu1 %v350_v10  ;;  %717 = vmatpush1.msra.mxu0 %v666_v53  ;;  %v659_v60 = vld [vmem:[#allocation8 + $0xa8] sm:$0xff]  ;;  %v658_v61 = vld [vmem:[#allocation8 + $0xa0] sm:$0xff]  ;;  %v657_v62 = vld [vmem:[#allocation8 + $0x98] sm:$0xff] }
  0x7d   : > { %1027 = vmatprep.subr.mxu1 %v349_v11  ;;  %718 = vmatprep.subr.mxu0 %v665_v54  ;;  %v656_v63 = vld [vmem:[#allocation8 + $0x90] sm:$0xff]  ;;  %v655_v0 = vld [vmem:[#allocation8 + $0x88] sm:$0xff]  ;;  %v654_v1 = vld [vmem:[#allocation8 + $0x80] sm:$0xff] }
  0x7e   : > { %1028 = vmatpush3.msra.mxu1 %v349_v11  ;;  %719 = vmatpush1.msra.mxu0 %v664_v55  ;;  %v653_v2 = vld [vmem:[#allocation8 + $0x78] sm:$0xff]  ;;  %v652_v3 = vld [vmem:[#allocation8 + $0x70] sm:$0xff]  ;;  %v651_v4 = vld [vmem:[#allocation8 + $0x68] sm:$0xff] }
  0x7f   : > { %1029 = vmatprep.subr.mxu1 %v348_v12  ;;  %720 = vmatprep.subr.mxu0 %v663_v56  ;;  %v650_v5 = vld [vmem:[#allocation8 + $0x60] sm:$0xff]  ;;  %v649_v6 = vld [vmem:[#allocation8 + $0x58] sm:$0xff]  ;;  %v648_v7 = vld [vmem:[#allocation8 + $0x50] sm:$0xff] }
  0x80   : > { %1030 = vmatpush3.msra.mxu1 %v348_v12  ;;  %721 = vmatpush1.msra.mxu0 %v662_v57  ;;  %v647_v8 = vld [vmem:[#allocation8 + $0x48] sm:$0xff]  ;;  %v646_v9 = vld [vmem:[#allocation8 + $0x40] sm:$0xff]  ;;  %v645_v10 = vld [vmem:[#allocation8 + $0x38] sm:$0xff] }
  0x81   : > { %1031 = vmatprep.subr.mxu1 %v347_v13  ;;  %722 = vmatprep.subr.mxu0 %v661_v58  ;;  %v644_v11 = vld [vmem:[#allocation8 + $0x30] sm:$0xff]  ;;  %v643_v12 = vld [vmem:[#allocation8 + $0x28] sm:$0xff]  ;;  %v682_v50 = vld [vmem:[#allocation8 + $0x160] sm:$0xff] }
  0x82   : > { %1032 = vmatpush3.msra.mxu1 %v347_v13  ;;  %723 = vmatpush1.msra.mxu0 %v660_v59  ;;  %v642_v13 = vld [vmem:[#allocation8 + $0x20] sm:$0xff]  ;;  %v681_v51 = vld [vmem:[#allocation8 + $0x158] sm:$0xff]  ;;  %v680_v52 = vld [vmem:[#allocation8 + $0x150] sm:$0xff] }
  0x83   : > { %1034 = vmatmul.mubr.msk.f32.vlgmr.msra.gmra.mxu1 %vm367_vm1, %v344_v14  ;;  %517 = vmatprep.subr.mxu1 %v504_v15  ;;  %v641_v14 = vld [vmem:[#allocation8 + $0x18] sm:$0xff]  ;;  %v640_v15 = vld [vmem:[#allocation8 + $0x10] sm:$0xff]  ;;  %v679_v53 = vld [vmem:[#allocation8 + $0x148] sm:$0xff] }
  0x84   : > { %1036 = vmatprep.mubr.msk.f32.mxu1 %vm367_vm1, %v345_v16  ;;  %518 = vmatpush1.msra.mxu1 %v503_v17  ;;  %v639_v16 = vld [vmem:[#allocation8 + $0x8] sm:$0xff]  ;;  %v638_v17 = vld [vmem:[#allocation8] sm:$0xff]  ;;  %v677_v55 = vld [vmem:[#allocation8 + $0x138] sm:$0xff] }
  0x85   : > { %519 = vmatprep.subr.mxu1 %v502_v18  ;;  %724 = vmatprep.subr.mxu0 %v659_v60  ;;  %v701_v18 = vld [vmem:[#allocation8 + $0x1f8] sm:$0xff]  ;;  %v678_v54 = vld [vmem:[#allocation8 + $0x140] sm:$0xff]  ;;  %v676_v56 = vld [vmem:[#allocation8 + $0x130] sm:$0xff] }
  0x86   : > { %520 = vmatpush1.msra.mxu1 %v501_v19  ;;  %725 = vmatpush1.msra.mxu0 %v658_v61  ;;  %v700_v19 = vld [vmem:[#allocation8 + $0x1f0] sm:$0xff]  ;;  %v675_v57 = vld [vmem:[#allocation8 + $0x128] sm:$0xff]  ;;  %v674_v58 = vld [vmem:[#allocation8 + $0x120] sm:$0xff] }
  0x87   : > { %1037 = vmatmul.mubr.msk.f32.gmra.mxu1 %vm367_vm1, %v346_v20  ;;  %521 = vmatprep.subr.mxu1 %v500_v21  ;;  %v699_v20 = vld [vmem:[#allocation8 + $0x1e8] sm:$0xff]  ;;  %v698_v21 = vld [vmem:[#allocation8 + $0x1e0] sm:$0xff]  ;;  %v673_v59 = vld [vmem:[#allocation8 + $0x118] sm:$0xff] }
  0x88   : > { %522 = vmatpush1.msra.mxu1 %v499_v22  ;;  %581 = vmatprep.mubr.f32.mxu1 %v1343_v49  ;;  %v697_v22 = vld [vmem:[#allocation8 + $0x1d8] sm:$0xff]  ;;  %v672_v60 = vld [vmem:[#allocation8 + $0x110] sm:$0xff]  ;;  %v671_v61 = vld [vmem:[#allocation8 + $0x108] sm:$0xff] }
  0x89   : > { %523 = vmatprep.subr.mxu1 %v498_v23  ;;  %726 = vmatprep.subr.mxu0 %v657_v62  ;;  %v696_v23 = vld [vmem:[#allocation8 + $0x1d0] sm:$0xff]  ;;  %v670_v62 = vld [vmem:[#allocation8 + $0x100] sm:$0xff] }
  0x8a   : > { %524 = vmatpush1.msra.mxu1 %v497_v24  ;;  %727 = vmatpush1.msra.mxu0 %v656_v63  ;;  %v507_v63 = vlaneseq }
  0x8b   : > { %525 = vmatprep.subr.mxu1 %v496_v25  ;;  %728 = vmatprep.subr.mxu0 %v655_v0  ;;  %v975_v25 = vld [vmem:[%s1631_s2] ss:$0 sm:$0xff] }
  0x8c   : > { %526 = vmatpush1.msra.mxu1 %v495_v26  ;;  %729 = vmatpush1.msra.mxu0 %v654_v1  ;;  %v1561_v0 = vshrl.u32 %v507_v63, 7 }
  0x8d   : > { %527 = vmatprep.subr.mxu1 %v494_v27  ;;  %730 = vmatprep.subr.mxu0 %v653_v2  ;;  %v505_v2 = vld [vmem:[%s1633_s4] sm:$0x3] }
  0x8e   : > { %528 = vmatpush1.msra.mxu1 %v493_v28  ;;  %731 = vmatpush1.msra.mxu0 %v652_v3  ;;  %v509_v1 = vsub.s32 0, %v1561_v0  ;;  %v513_v3 = vsub.s32 1, %v1561_v0 }
  0x8f   : > { %529 = vmatprep.subr.mxu1 %v492_v29  ;;  %732 = vmatprep.subr.mxu0 %v651_v4 }
  0x90   : > { %530 = vmatpush1.msra.mxu1 %v491_v30  ;;  %733 = vmatpush1.msra.mxu0 %v650_v5  ;;  %v510_v4 = vrot.slane %v505_v2, %v509_v1  ;;  %v514_v5 = vrot.slane %v505_v2, %v513_v3 }
  0x91   : > { %531 = vmatprep.subr.mxu1 %v490_v31  ;;  %734 = vmatprep.subr.mxu0 %v649_v6 }
  0x92   : > { %532 = vmatpush1.msra.mxu1 %v489_v32  ;;  %735 = vmatpush1.msra.mxu0 %v648_v7 }
  0x93   : > { %533 = vmatprep.subr.mxu1 %v488_v33  ;;  %736 = vmatprep.subr.mxu0 %v647_v8 }
  0x94   : > { %534 = vmatpush1.msra.mxu1 %v487_v34  ;;  %737 = vmatpush1.msra.mxu0 %v646_v9 }
  0x95   : > { %535 = vmatprep.subr.mxu1 %v486_v35  ;;  %738 = vmatprep.subr.mxu0 %v645_v10 }
  0x96   : > { %536 = vmatpush1.msra.mxu1 %v485_v36  ;;  %739 = vmatpush1.msra.mxu0 %v644_v11 }
  0x97   : > { %537 = vmatprep.subr.mxu1 %v484_v37  ;;  %740 = vmatprep.subr.mxu0 %v643_v12  ;;  %v695_v37 = vld [vmem:[#allocation8 + $0x1c8] sm:$0xff] }
  0x98   : > { %538 = vmatpush1.msra.mxu1 %v483_v38  ;;  %741 = vmatpush1.msra.mxu0 %v642_v13  ;;  %v694_v38 = vld [vmem:[#allocation8 + $0x1c0] sm:$0xff] }
  0x99   : > { %539 = vmatprep.subr.mxu1 %v482_v39  ;;  %742 = vmatprep.subr.mxu0 %v641_v14  ;;  %v693_v39 = vld [vmem:[#allocation8 + $0x1b8] sm:$0xff] }
  0x9a   : > { %540 = vmatpush1.msra.mxu1 %v481_v40  ;;  %743 = vmatpush1.msra.mxu0 %v640_v15  ;;  %v692_v40 = vld [vmem:[#allocation8 + $0x1b0] sm:$0xff] }
  0x9b   : > { %541 = vmatprep.subr.mxu1 %v480_v41  ;;  %744 = vmatprep.subr.mxu0 %v639_v16  ;;  %v691_v41 = vld [vmem:[#allocation8 + $0x1a8] sm:$0xff] }
  0x9c   : > { %542 = vmatpush1.msra.mxu1 %v479_v42  ;;  %745 = vmatpush1.msra.mxu0 %v638_v17  ;;  %v690_v42 = vld [vmem:[#allocation8 + $0x1a0] sm:$0xff] }
  0x9d   : > { %543 = vmatprep.subr.mxu1 %v478_v43  ;;  %746 = vmatprep.subr.mxu0 %v701_v18  ;;  %v689_v43 = vld [vmem:[#allocation8 + $0x198] sm:$0xff] }
  0x9e   : > { %544 = vmatpush1.msra.mxu1 %v477_v44  ;;  %747 = vmatpush2.msra.mxu0 %v700_v19  ;;  %v688_v44 = vld [vmem:[#allocation8 + $0x190] sm:$0xff] }
  0x9f   : > { %545 = vmatprep.subr.mxu1 %v476_v45  ;;  %748 = vmatprep.subr.mxu0 %v699_v20  ;;  %v687_v45 = vld [vmem:[#allocation8 + $0x188] sm:$0xff] }
  0xa0   : > { %546 = vmatpush1.msra.mxu1 %v475_v46  ;;  %749 = vmatpush2.msra.mxu0 %v698_v21  ;;  %v686_v46 = vld [vmem:[#allocation8 + $0x180] sm:$0xff] }
  0xa1   : > { %547 = vmatprep.subr.mxu1 %v474_v47  ;;  %750 = vmatprep.subr.mxu0 %v697_v22  ;;  %v685_v47 = vld [vmem:[#allocation8 + $0x178] sm:$0xff] }
  0xa2   : > { %548 = vmatpush1.msra.mxu1 %v473_v48  ;;  %751 = vmatpush2.msra.mxu0 %v696_v23  ;;  %v684_v48 = vld [vmem:[#allocation8 + $0x170] sm:$0xff] }
  0xa3   : > { %752 = vmatprep.subr.mxu0 %v695_v37 }
  0xa4   : > { %753 = vmatpush2.msra.mxu0 %v694_v38 }
  0xa5   : > { %754 = vmatprep.subr.mxu0 %v693_v39 }
  0xa6   : > { %755 = vmatpush2.msra.mxu0 %v692_v40 }
  0xa7   : > { %756 = vmatprep.subr.mxu0 %v691_v41 }
  0xa8   : > { %757 = vmatpush2.msra.mxu0 %v690_v42 }
  0xa9   : > { %758 = vmatprep.subr.mxu0 %v689_v43 }
  0xaa   : > { %759 = vmatpush2.msra.mxu0 %v688_v44 }
  0xab   : > { %760 = vmatprep.subr.mxu0 %v687_v45 }
  0xac   : > { %761 = vmatpush2.msra.mxu0 %v686_v46 }
  0xad   : > { %762 = vmatprep.subr.mxu0 %v685_v47 }
  0xae   : > { %763 = vmatpush2.msra.mxu0 %v684_v48 }
 0x143   : > { %v1035_v24 = vpop.f32.mrf.mxu1 }
 0x144   : > { %v456_v29 = vadd.f32 %v1035_v24, %v975_v25 }
 0x145   : > { %v450_v26 = vpop.f32.mrf.mxu1 }
 0x146   : > { %v451_v27 = vadd.f32 %v975_v25, %v450_v26  ;;  %v470_v32 = vmax.f32 %v456_v29, 0.0 }
 0x147   : > { %v1038_v28 = vpop.f32.mrf.mxu1 }
 0x148   : > { %v469_v30 = vmax.f32 %v451_v27, 0.0  ;;  %v466_v34 = vadd.f32 %v1038_v28, %v975_v25 }
 0x149   : > { %v460_v31 = vpop.f32.mrf.mxu1 }
 0x14a   : > { %582 = vmatmul.mubr.f32.vlgmr.msra.gmra.mxu1 %v469_v30  ;;  %v461_v33 = vadd.f32 %v975_v25, %v460_v31  ;;  %v472_v36 = vmax.f32 %v466_v34, 0.0 }
 0x14b   : > { %587 = vmatprep.mubr.f32.mxu1 %v1343_v49 }
 0x14c   : > { %v471_v35 = vmax.f32 %v461_v33, 0.0 }
 0x14e   : > { %588 = vmatmul.mubr.f32.gmra.mxu1 %v470_v32 }
 0x14f   : > { %593 = vmatprep.mubr.f32.mxu1 %v1343_v49 }
 0x152   : > { %594 = vmatmul.mubr.f32.gmra.mxu1 %v471_v35 }
 0x153   : > { %599 = vmatprep.mubr.f32.mxu1 %v1343_v49  ;;  %v683_v49 = vld [vmem:[#allocation8 + $0x168] sm:$0xff] }
 0x154   : > { %764 = vmatprep.subr.mxu0 %v683_v49 }
 0x155   : > { %765 = vmatpush2.msra.mxu0 %v682_v50 }
 0x156   : > { %600 = vmatmul.mubr.f32.gmra.mxu1 %v472_v36  ;;  %766 = vmatprep.subr.mxu0 %v681_v51 }
 0x157   : > { %767 = vmatpush2.msra.mxu0 %v680_v52 }
 0x158   : > { %768 = vmatprep.subr.mxu0 %v679_v53 }
 0x159   : > { %769 = vmatpush2.msra.mxu0 %v678_v54  ;;  %v702_v54 = vld [vmem:[%s1635_s6] sm:$0x3] }
 0x15a   : > { %770 = vmatprep.subr.mxu0 %v677_v55  ;;  %v707_v55 = vrot.slane %v702_v54, %v509_v1 }
 0x15b   : > { %771 = vmatpush2.msra.mxu0 %v676_v56  ;;  %v711_v56 = vrot.slane %v702_v54, %v513_v3 }
 0x15c   : > { %772 = vmatprep.subr.mxu0 %v675_v57 }
 0x15d   : > { %773 = vmatpush2.msra.mxu0 %v674_v58 }
 0x15e   : > { %774 = vmatprep.subr.mxu0 %v673_v59 }
 0x15f   : > { %775 = vmatpush2.msra.mxu0 %v672_v60 }
 0x160   : > { %776 = vmatprep.subr.mxu0 %v671_v61 }
 0x161   : > { %777 = vmatpush2.msra.mxu0 %v670_v62 }
 0x20a   : > { %v583_v6 = vpop.f32.mrf.mxu1 }
 0x20b   : > { %v584_v7 = vadd.f32 %v583_v6, %v510_v4 }
 0x20c   : > { %v585_v8 = vpop.f32.mrf.mxu1 }
 0x20d   : > { %v606_v9 = vmul.f32 0.5, %v584_v7  ;;  %v586_v10 = vadd.f32 %v585_v8, %v514_v5 }
 0x20e   : > { %v589_v11 = vpop.f32.mrf.mxu1 }
 0x20f   : > { %1123 = vtanh.f32 %v606_v9  ;;  %v607_v12 = vmul.f32 0.5, %v586_v10  ;;  %v590_v13 = vadd.f32 %v589_v11, %v510_v4 }
 0x210   : > { %v591_v14 = vpop.f32.mrf.mxu1 }
 0x211   : > { %1125 = vtanh.f32 %v607_v12  ;;  %v608_v15 = vmul.f32 0.5, %v590_v13  ;;  %v592_v16 = vadd.f32 %v591_v14, %v514_v5 }
 0x212   : > { %v595_v17 = vpop.f32.mrf.mxu1 }
 0x213   : > { %1127 = vtanh.f32 %v608_v15  ;;  %v609_v18 = vmul.f32 0.5, %v592_v16  ;;  %v596_v19 = vadd.f32 %v595_v17, %v510_v4 }
 0x214   : > { %v597_v20 = vpop.f32.mrf.mxu1 }
 0x215   : > { %1129 = vtanh.f32 %v609_v18  ;;  %v610_v21 = vmul.f32 0.5, %v596_v19  ;;  %v598_v22 = vadd.f32 %v597_v20, %v514_v5 }
 0x216   : > { %v601_v23 = vpop.f32.mrf.mxu1 }
 0x217   : > { %1131 = vtanh.f32 %v610_v21  ;;  %v611_v24 = vmul.f32 0.5, %v598_v22  ;;  %v602_v25 = vadd.f32 %v601_v23, %v510_v4 }
 0x218   : > { %v603_v26 = vpop.f32.mrf.mxu1 }
 0x219   : > { %1133 = vtanh.f32 %v611_v24  ;;  %v612_v27 = vmul.f32 0.5, %v602_v25  ;;  %v604_v28 = vadd.f32 %v603_v26, %v514_v5 }
 0x21b   : > { %1135 = vtanh.f32 %v612_v27  ;;  %v613_v29 = vmul.f32 0.5, %v604_v28 }
 0x21c   : > { %v1124_v30 = vpop.eup %1123 }
 0x21d   : > { %1137 = vtanh.f32 %v613_v29  ;;  %v622_v32 = vmul.f32 0.5, %v1124_v30 }
 0x21e   : > { %v1126_v31 = vpop.eup %1125 }
 0x21f   : > { %v623_v33 = vmul.f32 0.5, %v1126_v31  ;;  %v630_v37 = vadd.f32 0.5, %v622_v32 }
 0x220   : > { %v1128_v34 = vpop.eup %1127 }
 0x221   : > { %v631_v35 = vadd.f32 0.5, %v623_v33  ;;  %v624_v38 = vmul.f32 0.5, %v1128_v34 }
 0x222   : > { %v1130_v36 = vpop.eup %1129 }
 0x223   : > { %778 = vmatprep.mubr.f32.mxu0 %v631_v35  ;;  %v625_v39 = vmul.f32 0.5, %v1130_v36  ;;  %v632_v43 = vadd.f32 0.5, %v624_v38 }
 0x224   : > { %v1132_v40 = vpop.eup %1131  ;;  %779 = vmatmul.mubr.f32.vlgmr.msra.gmra.mxu0 %v630_v37 }
 0x225   : > { %v633_v41 = vadd.f32 0.5, %v625_v39  ;;  %v626_v44 = vmul.f32 0.5, %v1132_v40 }
 0x226   : > { %v1134_v42 = vpop.eup %1133 }
 0x227   : > { %784 = vmatprep.mubr.f32.mxu0 %v633_v41  ;;  %v627_v45 = vmul.f32 0.5, %v1134_v42  ;;  %v634_v49 = vadd.f32 0.5, %v626_v44 }
 0x228   : > { %v1136_v46 = vpop.eup %1135  ;;  %785 = vmatmul.mubr.f32.gmra.mxu0 %v632_v43 }
 0x229   : > { %v635_v47 = vadd.f32 0.5, %v627_v45  ;;  %v628_v50 = vmul.f32 0.5, %v1136_v46 }
 0x22a   : > { %v1138_v48 = vpop.eup %1137 }
 0x22b   : > { %790 = vmatprep.mubr.f32.mxu0 %v635_v47  ;;  %v629_v51 = vmul.f32 0.5, %v1138_v48  ;;  %v636_v53 = vadd.f32 0.5, %v628_v50 }
 0x22c   : > { %791 = vmatmul.mubr.f32.gmra.mxu0 %v634_v49 }
 0x22d   : > { %v637_v52 = vadd.f32 0.5, %v629_v51 }
 0x22f   : > { %796 = vmatprep.mubr.f32.mxu0 %v637_v52 }
 0x230   : > { %797 = vmatmul.mubr.f32.gmra.mxu0 %v636_v53 }
 0x2e4   : > { %v780_v57 = vpop.f32.mrf.mxu0 }
 0x2e5   : > { %v781_v58 = vadd.f32 %v780_v57, %v707_v55 }
 0x2e6   : > { %v782_v59 = vpop.f32.mrf.mxu0 }
 0x2e7   : > { %v803_v60 = vmul.f32 0.5, %v781_v58  ;;  %v783_v61 = vadd.f32 %v782_v59, %v711_v56 }
 0x2e8   : > { %v786_v62 = vpop.f32.mrf.mxu0 }
 0x2e9   : > { %1139 = vtanh.f32 %v803_v60  ;;  %v804_v63 = vmul.f32 0.5, %v783_v61  ;;  %v787_v2 = vadd.f32 %v786_v62, %v707_v55 }
 0x2ea   : > { %v788_v4 = vpop.f32.mrf.mxu0 }
 0x2eb   : > { %1141 = vtanh.f32 %v804_v63  ;;  %v805_v5 = vmul.f32 0.5, %v787_v2  ;;  %v789_v6 = vadd.f32 %v788_v4, %v711_v56 }
 0x2ec   : > { %v792_v7 = vpop.f32.mrf.mxu0 }
 0x2ed   : > { %1143 = vtanh.f32 %v805_v5  ;;  %v806_v1 = vmul.f32 0.5, %v789_v6  ;;  %v793_v8 = vadd.f32 %v792_v7, %v707_v55 }
 0x2ee   : > { %v794_v0 = vpop.f32.mrf.mxu0 }
 0x2ef   : > { %1145 = vtanh.f32 %v806_v1  ;;  %v807_v3 = vmul.f32 0.5, %v793_v8  ;;  %v795_v9 = vadd.f32 %v794_v0, %v711_v56 }
 0x2f0   : > { %v798_v10 = vpop.f32.mrf.mxu0 }
 0x2f1   : > { %1147 = vtanh.f32 %v807_v3  ;;  %v808_v11 = vmul.f32 0.5, %v795_v9  ;;  %v799_v12 = vadd.f32 %v798_v10, %v707_v55 }
 0x2f2   : > { %v800_v13 = vpop.f32.mrf.mxu0 }
 0x2f3   : > { %1149 = vtanh.f32 %v808_v11  ;;  %v809_v14 = vmul.f32 0.5, %v799_v12  ;;  %v801_v15 = vadd.f32 %v800_v13, %v711_v56 }
 0x2f5   : > { %1151 = vtanh.f32 %v809_v14  ;;  %v810_v16 = vmul.f32 0.5, %v801_v15 }
 0x2f6   : > { %v1140_v17 = vpop.eup %1139 }
 0x2f7   : > { %v819_v18 = vmul.f32 0.5, %v1140_v17  ;;  %1153 = vtanh.f32 %v810_v16 }
 0x2f8   : > { %v1142_v19 = vpop.eup %1141 }
 0x2f9   : > { %v827_v20 = vadd.f32 0.5, %v819_v18  ;;  %v820_v21 = vmul.f32 0.5, %v1142_v19 }
 0x2fa   : > { %v1144_v22 = vpop.eup %1143 }
 0x2fb   : > { %835 = vst [vmem:[%s340_s29] sm:$0xff] %v827_v20  ;;  %v828_v23 = vadd.f32 0.5, %v820_v21  ;;  %v821_v24 = vmul.f32 0.5, %v1144_v22 }
 0x2fc   : > { %v1146_v25 = vpop.eup %1145 }
 0x2fd   : > { %836 = vst [vmem:[%s340_s29 + $0x8] sm:$0xff] %v828_v23  ;;  %v829_v26 = vadd.f32 0.5, %v821_v24  ;;  %v822_v27 = vmul.f32 0.5, %v1146_v25 }
 0x2fe   : > { %v1148_v28 = vpop.eup %1147 }
 0x2ff   : > { %837 = vst [vmem:[%s340_s29 + $0x10] sm:$0xff] %v829_v26  ;;  %v830_v29 = vadd.f32 0.5, %v822_v27  ;;  %v823_v30 = vmul.f32 0.5, %v1148_v28 }
 0x300   : > { %v1150_v31 = vpop.eup %1149 }
 0x301   : > { %838 = vst [vmem:[%s340_s29 + $0x18] sm:$0xff] %v830_v29  ;;  %v831_v32 = vadd.f32 0.5, %v823_v30  ;;  %v824_v33 = vmul.f32 0.5, %v1150_v31 }
 0x302   : > { %v1152_v34 = vpop.eup %1151 }
 0x303   : > { %839 = vst [vmem:[%s340_s29 + $0x20] sm:$0xff] %v831_v32  ;;  %v832_v35 = vadd.f32 0.5, %v824_v33  ;;  %v825_v36 = vmul.f32 0.5, %v1152_v34 }
 0x304   : > { %v1154_v37 = vpop.eup %1153 }
 0x305   : > { %840 = vst [vmem:[%s340_s29 + $0x28] sm:$0xff] %v832_v35  ;;  %v833_v38 = vadd.f32 0.5, %v825_v36  ;;  %v826_v39 = vmul.f32 0.5, %v1154_v37 }
 0x307   : > { %841 = vst [vmem:[%s340_s29 + $0x30] sm:$0xff] %v833_v38  ;;  %v834_v40 = vadd.f32 0.5, %v826_v39 }
 0x309   : > { %842 = vst [vmem:[%s340_s29 + $0x38] sm:$0xff] %v834_v40 }
 0x30a   : > { %1274 = shalt.err (!%p1271_p9)
}
 0x30b   : > { %s1275_s11 = scalar_lea.hbm %s1584_s15, 1024  ;;  %s1279_s22 = scalar_lea.hbm %s1636_s7, 2048 }
 0x30c   : > { %p1276_p1 = scmp.ne.s32.totalorder %s1584_s15, %s1275_s11  ;;  %p1280_p8 = scmp.lt.s32.totalorder %s1584_s15, %s1636_s7 }
 0x30d   : > { %p1281_p3 = scmp.lt.s32.totalorder %s1279_s22, %s1275_s11 }
 0x30e   : > { %p1277_p4 = pnand %p1276_p1, %p1659_p12 }
 0x30f   : > { %p1282_p11 = por %p1281_p3, %p1280_p8 }
 0x310   : > { %p1278_p6 = pneg %p1277_p4 }
 0x312   : > { %p1283_p7 = pnand %p1282_p11, %p1278_p6 }
 0x314   : > { %1286 = shalt.err (!%p1283_p7)
}
 0x315   : > { %s1345_s18 = smov 256   ;;  %s1346_s1 = smov 16  }
 0x316   : > { %1053 = dma.vmem_to_hbm [thread:$0]  (%p1659_p12), %s1586_s16, 1024, %s1584_s15, %s844_s14, %s1345_s18, %s1345_s18, %s1346_s1  }
 0x317 PF: > { %s873_s28 = sand.u32 1, %s1321_s24   ;;  %p1660_p13 = scmp.ne.s32.totalorder %s1645_s8, 0 }
 0x318   : > { %p1661_p0 = scmp.ge.s32.totalorder %s1333_s27, 2  ;;  %s874_s30 = scalar_lea.sflag [#allocation4], %s873_s28 }
 0x31a   : > { %p1070_p5 = pnand %p1661_p0, %p1660_p13 }
 0x31c   : > { %p1071_p10 = pneg %p1070_p5 }
 0x31e   : > { %1316 = dma.done.wait (%p1071_p10), %s874_s30, 1024  }
 0x31f   : > { %1318 = vsyncadd (%p1071_p10), %s874_s30, 4294966272  ;;  %p22_p2 = scmp.ge.s32.totalorder %s1462_s13, 4   ;;  %s1662_s24 = smov %s1325_s25 }
 0x320   : > { %s1663_s25 = smov %s1329_s26  ;;  %s1664_s26 = smov %s1480_s12 }
 0x321   : > { %s1665_s27 = smov %s1462_s13  ;;  %24 = sbr.rel (!%p22_p2) target bundleno = 9 (0x9), region = 105 }
 0x326   :  { %879 = vsyncpa [#allocation3], 1 }
 0x327   :  { %881 = vsyncpa [#allocation3 + $0x1], 1 }
 0x328   :  { %882 = vsyncpa [#allocation6], 1 }
 0x329   :  { %883 = vsyncpa [#allocation9], 1 }
 0x32a   :  { %884 = vsyncpa [#allocation4], 1 }
 0x32b   :  { %886 = vsyncpa [#allocation4 + $0x1], 1 }

</bundles_post_ra>
